<compile_context>
chip_gen: v7x
topology: tpu7x:2x2x1
jax: 0.10.0
libtpu: 0.0.40
codegen_flags: <defaults>
</compile_context>

<pallas_src>
import jax
import jax.numpy as jnp
from jax.experimental import pallas as pl
from jax.experimental.pallas import tpu as pltpu

NEG_SLOPE = 0.01  # nn.LeakyReLU default
BN_EPS = 1e-5     # nn.BatchNorm2d default


def _leaky(x):
    return jnp.where(x >= 0, x, NEG_SLOPE * x)


# --------------------------------------------------------------------------
# Kernel
# --------------------------------------------------------------------------
def basic_block_kernel(x_ref, B1_ref, b1_ref, B2_ref, b2_ref, o_ref):
    """Fused conv3x3 -> BN1 -> LeakyReLU -> conv3x3 -> BN2 -> +res -> LeakyReLU.

    x_ref  : (NB, H, W*Cin)        NB images, lane-dense NHWC-flattened slabs
    B1_ref : (3*W*Cin, W*Cout)     conv1 kh-stacked banded weights (BN1 folded), bf16
    b1_ref : (1, W*Cout)           BN1 folded bias, tiled over W
    B2_ref : (3*W*Cout, W*Cout)    conv2 kh-stacked banded weights (BN2 folded), bf16
    b2_ref : (1, W*Cout)           BN2 folded bias, tiled over W
    o_ref  : (NB, H, W*Cout)       output slabs
    """
    NB, H, WC = x_ref.shape
    WCo = o_ref.shape[2]
    M = NB * H

    # (NB, H, WC) -> (M, WC): merges leading dims only, no data movement.
    x = x_ref[...].reshape(M, WC)            # f32; also the identity residual

    # Per-image height masks so the roll never leaks rows across images
    # (or wraps around the whole block).
    row = jax.lax.broadcasted_iota(jnp.int32, (M, 1), 0)
    not_top = (row % H) != 0                  # row h-1 exists
    not_bot = (row % H) != (H - 1)            # row h+1 exists

    def stacked_lhs(a):
        """[rows h-1 | rows h | rows h+1] in bf16, width padding is in the band."""
        up = jnp.where(not_top, pltpu.roll(a, 1, axis=0), 0.0)        # a[m-1]
        dn = jnp.where(not_bot, pltpu.roll(a, M - 1, axis=0), 0.0)    # a[m+1]
        return jnp.concatenate(
            [up.astype(jnp.bfloat16),
             a.astype(jnp.bfloat16),
             dn.astype(jnp.bfloat16)], axis=-1)                        # (M, 3*WC)

    # ---- conv1 + BN1 (scale folded into B1, bias added here) + LeakyReLU ----
    y1 = jnp.dot(stacked_lhs(x), B1_ref[...],
                 preferred_element_type=jnp.float32) + b1_ref[...]
    y1 = _leaky(y1)

    # ---- conv2 + BN2 bias + identity residual + LeakyReLU ----
    y2 = (jnp.dot(stacked_lhs(y1), B2_ref[...],
                  preferred_element_type=jnp.float32)
          + b2_ref[...]
          + x)                                 # identity residual (Cin == Cout)
    o_ref[...] = _leaky(y2).reshape(NB, H, WCo)


# --------------------------------------------------------------------------
# Parameter preparation (hoisted: done once, not per forward call)
# --------------------------------------------------------------------------
def _build_banded_stacked(w_eff, W):
    """kh-stacked banded weight (3*W*Cin, W*Cout).

    w_eff: (9, Cin, Cout), tap-major (k = kh*3 + kw), BN scale already folded.
    Row block kh satisfies
      B[kh*W*Cin + wi*Cin + ci, w*Cout + co] = w_eff[kh*3+kw, ci, co]
    where wi = w + kw - 1, zero when wi falls outside [0, W) — i.e. width
    zero-padding is encoded in the band.
    """
    _, Cin, Cout = w_eff.shape
    wi = jnp.arange(W)[:, None]   # input column index
    wo = jnp.arange(W)[None, :]   # output column index
    bands = []
    for kh in range(3):
        Bk = jnp.zeros((W, Cin, W, Cout), jnp.float32)
        for kw in range(3):
            sel = (wi == wo + (kw - 1)).astype(jnp.float32)            # (W, W)
            Bk = Bk + sel[:, None, :, None] * w_eff[kh * 3 + kw][None, :, None, :]
        bands.append(Bk.reshape(W * Cin, W * Cout))
    return jnp.concatenate(bands, axis=0)      # (3*W*Cin, W*Cout)


def make_basic_block_params(w1, g1, be1, m1, v1, w2, g2, be2, m2, v2, W):
    """Fold eval-mode BN and build the kh-stacked banded weights once."""
    Cout = w1.shape[-1]
    s1 = g1 / jnp.sqrt(v1 + BN_EPS)
    s2 = g2 / jnp.sqrt(v2 + BN_EPS)
    bias1 = be1 - m1 * s1
    bias2 = be2 - m2 * s2
    w1_eff = w1 * s1[None, None, :]
    w2_eff = w2 * s2[None, None, :]
    B1 = _build_banded_stacked(w1_eff, W).astype(jnp.bfloat16)   # (3*W*Cin,  W*Cout)
    B2 = _build_banded_stacked(w2_eff, W).astype(jnp.bfloat16)   # (3*W*Cout, W*Cout)
    b1t = jnp.tile(bias1, W).reshape(1, W * Cout).astype(jnp.float32)
    b2t = jnp.tile(bias2, W).reshape(1, W * Cout).astype(jnp.float32)
    return B1, b1t, B2, b2t


def _pick_images_per_step(N, H):
    """Target M = NB*H >= ~128 rows per MXU push; keep >=2 parallel grid
    steps (v7x megacore) when that does not drop M below 128."""
    nb = min(N, max(1, 128 // max(H, 1)))
    if nb == N and N >= 2 and (N // 2) * H >= 128:
        nb = N // 2
    while N % nb:      # only full blocks (simplest correct tiling)
        nb -= 1
    return nb


# --------------------------------------------------------------------------
# Entry points
# --------------------------------------------------------------------------
def basic_block_lane_dense(x2d, params, *, H, W, Cin, Cout, images_per_step=None):
    """x2d: (N, H, W*Cin) lane-dense slab. Returns (N, H, W*Cout)."""
    N = x2d.shape[0]
    B1, b1t, B2, b2t = params
    nb = images_per_step or _pick_images_per_step(N, H)

    # Weight/bias specs use constant index maps; Pallas skips re-copying an
    # unchanged block between grid steps, and at ~200 KiB total they fit any
    # VMEM budget, so no pl.Buffered(1) override is needed here.
    return pl.pallas_call(
        basic_block_kernel,
        out_shape=jax.ShapeDtypeStruct((N, H, W * Cout), jnp.float32),
        grid_spec=pltpu.PrefetchScalarGridSpec(
            num_scalar_prefetch=0,
            grid=(N // nb,),
            in_specs=[
                pl.BlockSpec((nb, H, W * Cin), lambda n: (n, 0, 0)),
                pl.BlockSpec((3 * W * Cin, W * Cout), lambda n: (0, 0)),
                pl.BlockSpec((1, W * Cout), lambda n: (0, 0)),
                pl.BlockSpec((3 * W * Cout, W * Cout), lambda n: (0, 0)),
                pl.BlockSpec((1, W * Cout), lambda n: (0, 0)),
            ],
            out_specs=pl.BlockSpec((nb, H, W * Cout), lambda n: (n, 0, 0)),
        ),
        compiler_params=pltpu.CompilerParams(
            dimension_semantics=("parallel",)),
    )(x2d, B1, b1t, B2, b2t)


def basic_block(x_nchw, w1, g1, be1, m1, v1, w2, g2, be2, m2, v2):
    """NCHW wrapper matching the PyTorch module boundary.

    For stacks of BasicBlocks, call make_basic_block_params once per block and
    chain basic_block_lane_dense directly so the NCHW<->lane-dense layout
    round-trip below is paid only at the network boundary.
    """
    N, Cin, H, W = x_nchw.shape
    Cout = w1.shape[-1]
    assert Cin == Cout, "identity residual requires inplanes == planes"

    params = make_basic_block_params(w1, g1, be1, m1, v1, w2, g2, be2, m2, v2, W)
    x2d = jnp.transpose(x_nchw, (0, 2, 3, 1)).reshape(N, H, W * Cin)
    out2d = basic_block_lane_dense(x2d, params, H=H, W=W, Cin=Cin, Cout=Cout)
    return jnp.transpose(out2d.reshape(N, H, W, Cout), (0, 3, 1, 2))   # -> NCHW


# --------------------------------------------------------------------------
# Pure-JAX reference + self-test
# --------------------------------------------------------------------------
def _reference(x_nchw, w1, g1, be1, m1, v1, w2, g2, be2, m2, v2):
    x = jnp.transpose(x_nchw, (0, 2, 3, 1))

    def conv(a, w):
        hwio = w.reshape(3, 3, w.shape[1], w.shape[2])
        return jax.lax.conv_general_dilated(
            a, hwio, window_strides=(1, 1), padding='SAME',
            dimension_numbers=('NHWC', 'HWIO', 'NHWC'))

    def bn(a, g, b, m, v):
        return (a - m) / jnp.sqrt(v + BN_EPS) * g + b

    y = _leaky(bn(conv(x, w1), g1, be1, m1, v1))
    y = bn(conv(y, w2), g2, be2, m2, v2)
    y = _leaky(y + x)
    return jnp.transpose(y, (0, 3, 1, 2))


if __name__ == "__main__":
    key = jax.random.PRNGKey(0)
    N, C, H, W = 2, 8, 16, 16   # inplanes == planes == 8, stride=1, no downsample

    ks = jax.random.split(key, 12)
    x = jax.random.normal(ks[0], (N, C, H, W), jnp.float32)

    fan_in = C * 9
    w1 = jax.random.normal(ks[1], (9, C, C), jnp.float32) / jnp.sqrt(fan_in)
    w2 = jax.random.normal(ks[2], (9, C, C), jnp.float32) / jnp.sqrt(fan_in)

    g1 = 1.0 + 0.1 * jax.random.normal(ks[3], (C,), jnp.float32)
    be1 = 0.1 * jax.random.normal(ks[4], (C,), jnp.float32)
    m1 = 0.1 * jax.random.normal(ks[5], (C,), jnp.float32)
    v1 = jax.random.uniform(ks[6], (C,), jnp.float32, 0.5, 1.5)

    g2 = 1.0 + 0.1 * jax.random.normal(ks[7], (C,), jnp.float32)
    be2 = 0.1 * jax.random.normal(ks[8], (C,), jnp.float32)
    m2 = 0.1 * jax.random.normal(ks[9], (C,), jnp.float32)
    v2 = jax.random.uniform(ks[10], (C,), jnp.float32, 0.5, 1.5)

    out = basic_block(x, w1, g1, be1, m1, v1, w2, g2, be2, m2, v2)
    out = jax.block_until_ready(out)

    ref = _reference(x, w1, g1, be1, m1, v1, w2, g2, be2, m2, v2)
    assert out.shape == (N, C, H, W)
    # bf16 operands at the MXU (f32 accumulation) => ~1e-2 relative error budget.
    assert jnp.allclose(out, ref, rtol=3e-2, atol=3e-2), "mismatch vs JAX reference"

    print("KERNEL_OK")
</pallas_src>

<mosaic_0001>
module attributes {stable_mosaic.version = 11 : i64} {
  func.func @basic_block_kernel(%arg0: i32, %arg1: memref<2x16x128xf32, #tpu.memory_space<vmem>>, %arg2: memref<384x128xbf16, #tpu.memory_space<vmem>>, %arg3: memref<1x128xf32, #tpu.memory_space<vmem>>, %arg4: memref<384x128xbf16, #tpu.memory_space<vmem>>, %arg5: memref<1x128xf32, #tpu.memory_space<vmem>>, %arg6: memref<2x16x128xf32, #tpu.memory_space<vmem>>) attributes {dimension_semantics = [#tpu.dimension_semantics<parallel>], iteration_bounds = array<i64: 1>, scalar_prefetch = 0 : i64, scratch_operands = 0 : i64, tpu.core_type = #tpu.core_type<tc>, window_params = [{transform_indices = @transform_0, window_bounds = array<i64: 2, 16, 128>}, {pipeline_mode = #tpu.pipeline_mode<synchronous>, transform_indices = @transform_1, window_bounds = array<i64: 384, 128>}, {pipeline_mode = #tpu.pipeline_mode<synchronous>, transform_indices = @transform_2, window_bounds = array<i64: 1, 128>}, {pipeline_mode = #tpu.pipeline_mode<synchronous>, transform_indices = @transform_3, window_bounds = array<i64: 384, 128>}, {pipeline_mode = #tpu.pipeline_mode<synchronous>, transform_indices = @transform_4, window_bounds = array<i64: 1, 128>}, {transform_indices = @transform_5, window_bounds = array<i64: 2, 16, 128>}]} {
    %c0 = arith.constant 0 : index
    %c0_0 = arith.constant 0 : index
    %c0_1 = arith.constant 0 : index
    %0 = vector.load %arg1[%c0, %c0_0, %c0_1] : memref<2x16x128xf32, #tpu.memory_space<vmem>>, vector<2x16x128xf32>
    %1 = vector.shape_cast %0 : vector<2x16x128xf32> to vector<32x128xf32>
    %2 = tpu.iota {dimensions = array<i32: 0>} : vector<32x1xi32>
    %c16_i32 = arith.constant 16 : i32
    %c0_i32 = arith.constant 0 : i32
    %3 = arith.cmpi eq, %c16_i32, %c0_i32 : i32
    %c1_i32 = arith.constant 1 : i32
    %4 = arith.select %3, %c1_i32, %c16_i32 : i32
    %5 = vector.broadcast %4 : i32 to vector<32x1xi32>
    %6 = arith.remsi %2, %5 : vector<32x1xi32>
    %c0_i32_2 = arith.constant 0 : i32
    %7 = vector.broadcast %c0_i32_2 : i32 to vector<32x1xi32>
    %8 = arith.cmpi ne, %6, %7 : vector<32x1xi32>
    %c0_i32_3 = arith.constant 0 : i32
    %9 = vector.broadcast %c0_i32_3 : i32 to vector<32x1xi32>
    %10 = arith.cmpi slt, %6, %9 : vector<32x1xi32>
    %c0_i32_4 = arith.constant 0 : i32
    %11 = arith.cmpi slt, %4, %c0_i32_4 : i32
    %12 = vector.broadcast %11 : i1 to vector<32x1xi1>
    %13 = vector.broadcast %12 : vector<32x1xi1> to vector<32x1xi1>
    %14 = arith.xori %10, %13 : vector<32x1xi1>
    %15 = arith.andi %14, %8 : vector<32x1xi1>
    %16 = vector.broadcast %4 : i32 to vector<32x1xi32>
    %17 = arith.addi %6, %16 : vector<32x1xi32>
    %18 = arith.select %15, %17, %6 : vector<32x1xi1>, vector<32x1xi32>
    %c0_i32_5 = arith.constant 0 : i32
    %19 = vector.broadcast %c0_i32_5 : i32 to vector<32x1xi32>
    %20 = arith.cmpi ne, %18, %19 : vector<32x1xi32>
    %c16_i32_6 = arith.constant 16 : i32
    %c0_i32_7 = arith.constant 0 : i32
    %21 = arith.cmpi eq, %c16_i32_6, %c0_i32_7 : i32
    %c1_i32_8 = arith.constant 1 : i32
    %22 = arith.select %21, %c1_i32_8, %c16_i32_6 : i32
    %23 = vector.broadcast %22 : i32 to vector<32x1xi32>
    %24 = arith.remsi %2, %23 : vector<32x1xi32>
    %c0_i32_9 = arith.constant 0 : i32
    %25 = vector.broadcast %c0_i32_9 : i32 to vector<32x1xi32>
    %26 = arith.cmpi ne, %24, %25 : vector<32x1xi32>
    %c0_i32_10 = arith.constant 0 : i32
    %27 = vector.broadcast %c0_i32_10 : i32 to vector<32x1xi32>
    %28 = arith.cmpi slt, %24, %27 : vector<32x1xi32>
    %c0_i32_11 = arith.constant 0 : i32
    %29 = arith.cmpi slt, %22, %c0_i32_11 : i32
    %30 = vector.broadcast %29 : i1 to vector<32x1xi1>
    %31 = vector.broadcast %30 : vector<32x1xi1> to vector<32x1xi1>
    %32 = arith.xori %28, %31 : vector<32x1xi1>
    %33 = arith.andi %32, %26 : vector<32x1xi1>
    %34 = vector.broadcast %22 : i32 to vector<32x1xi32>
    %35 = arith.addi %24, %34 : vector<32x1xi32>
    %36 = arith.select %33, %35, %24 : vector<32x1xi1>, vector<32x1xi32>
    %c15_i32 = arith.constant 15 : i32
    %37 = vector.broadcast %c15_i32 : i32 to vector<32x1xi32>
    %38 = arith.cmpi ne, %36, %37 : vector<32x1xi32>
    %c1_i32_12 = arith.constant 1 : i32
    %39 = tpu.dynamic_rotate %1 by %c1_i32_12 dim 0 : vector<32x128xf32>, i32 -> vector<32x128xf32>
    %cst = arith.constant 0.000000e+00 : f32
    %40 = vector.shape_cast %20 : vector<32x1xi1> to vector<32x1xi1>
    %41 = vector.broadcast %40 : vector<32x1xi1> to vector<32x128xi1>
    %42 = vector.broadcast %cst : f32 to vector<32x128xf32>
    %43 = arith.select %41, %39, %42 : vector<32x128xi1>, vector<32x128xf32>
    %c31_i32 = arith.constant 31 : i32
    %44 = tpu.dynamic_rotate %1 by %c31_i32 dim 0 : vector<32x128xf32>, i32 -> vector<32x128xf32>
    %cst_13 = arith.constant 0.000000e+00 : f32
    %45 = vector.shape_cast %38 : vector<32x1xi1> to vector<32x1xi1>
    %46 = vector.broadcast %45 : vector<32x1xi1> to vector<32x128xi1>
    %47 = vector.broadcast %cst_13 : f32 to vector<32x128xf32>
    %48 = arith.select %46, %44, %47 : vector<32x128xi1>, vector<32x128xf32>
    %49 = arith.truncf %43 : vector<32x128xf32> to vector<32x128xbf16>
    %50 = arith.truncf %1 : vector<32x128xf32> to vector<32x128xbf16>
    %51 = arith.truncf %48 : vector<32x128xf32> to vector<32x128xbf16>
    %52 = tpu.concatenate %49, %50, %51 in 1 : vector<32x128xbf16>, vector<32x128xbf16>, vector<32x128xbf16> -> vector<32x384xbf16>
    %c0_14 = arith.constant 0 : index
    %c0_15 = arith.constant 0 : index
    %53 = vector.load %arg2[%c0_14, %c0_15] : memref<384x128xbf16, #tpu.memory_space<vmem>>, vector<384x128xbf16>
    %cst_16 = arith.constant dense<0.000000e+00> : vector<32x128xf32>
    %54 = tpu.matmul %52, %53, %cst_16 {dimension_numbers = #tpu.dot_dimension_numbers<[1], [0], [0], [1], [0, 0, 1, 1], [], []>} : vector<32x384xbf16>, vector<384x128xbf16>, vector<32x128xf32> -> vector<32x128xf32>
    %c0_17 = arith.constant 0 : index
    %c0_18 = arith.constant 0 : index
    %55 = vector.load %arg3[%c0_17, %c0_18] : memref<1x128xf32, #tpu.memory_space<vmem>>, vector<1x128xf32>
    %56 = vector.broadcast %55 : vector<1x128xf32> to vector<32x128xf32>
    %57 = arith.addf %54, %56 : vector<32x128xf32>
    %cst_19 = arith.constant 0.000000e+00 : f32
    %58 = vector.broadcast %cst_19 : f32 to vector<32x128xf32>
    %59 = arith.cmpf oge, %57, %58 : vector<32x128xf32>
    %cst_20 = arith.constant 0.00999999977 : f32
    %60 = vector.broadcast %cst_20 : f32 to vector<32x128xf32>
    %61 = arith.mulf %60, %57 : vector<32x128xf32>
    %62 = arith.select %59, %57, %61 : vector<32x128xi1>, vector<32x128xf32>
    %c1_i32_21 = arith.constant 1 : i32
    %63 = tpu.dynamic_rotate %62 by %c1_i32_21 dim 0 : vector<32x128xf32>, i32 -> vector<32x128xf32>
    %cst_22 = arith.constant 0.000000e+00 : f32
    %64 = vector.shape_cast %20 : vector<32x1xi1> to vector<32x1xi1>
    %65 = vector.broadcast %64 : vector<32x1xi1> to vector<32x128xi1>
    %66 = vector.broadcast %cst_22 : f32 to vector<32x128xf32>
    %67 = arith.select %65, %63, %66 : vector<32x128xi1>, vector<32x128xf32>
    %c31_i32_23 = arith.constant 31 : i32
    %68 = tpu.dynamic_rotate %62 by %c31_i32_23 dim 0 : vector<32x128xf32>, i32 -> vector<32x128xf32>
    %cst_24 = arith.constant 0.000000e+00 : f32
    %69 = vector.shape_cast %38 : vector<32x1xi1> to vector<32x1xi1>
    %70 = vector.broadcast %69 : vector<32x1xi1> to vector<32x128xi1>
    %71 = vector.broadcast %cst_24 : f32 to vector<32x128xf32>
    %72 = arith.select %70, %68, %71 : vector<32x128xi1>, vector<32x128xf32>
    %73 = arith.truncf %67 : vector<32x128xf32> to vector<32x128xbf16>
    %74 = arith.truncf %62 : vector<32x128xf32> to vector<32x128xbf16>
    %75 = arith.truncf %72 : vector<32x128xf32> to vector<32x128xbf16>
    %76 = tpu.concatenate %73, %74, %75 in 1 : vector<32x128xbf16>, vector<32x128xbf16>, vector<32x128xbf16> -> vector<32x384xbf16>
    %c0_25 = arith.constant 0 : index
    %c0_26 = arith.constant 0 : index
    %77 = vector.load %arg4[%c0_25, %c0_26] : memref<384x128xbf16, #tpu.memory_space<vmem>>, vector<384x128xbf16>
    %cst_27 = arith.constant dense<0.000000e+00> : vector<32x128xf32>
    %78 = tpu.matmul %76, %77, %cst_27 {dimension_numbers = #tpu.dot_dimension_numbers<[1], [0], [0], [1], [0, 0, 1, 1], [], []>} : vector<32x384xbf16>, vector<384x128xbf16>, vector<32x128xf32> -> vector<32x128xf32>
    %c0_28 = arith.constant 0 : index
    %c0_29 = arith.constant 0 : index
    %79 = vector.load %arg5[%c0_28, %c0_29] : memref<1x128xf32, #tpu.memory_space<vmem>>, vector<1x128xf32>
    %80 = vector.broadcast %79 : vector<1x128xf32> to vector<32x128xf32>
    %81 = arith.addf %78, %80 : vector<32x128xf32>
    %82 = arith.addf %81, %1 : vector<32x128xf32>
    %cst_30 = arith.constant 0.000000e+00 : f32
    %83 = vector.broadcast %cst_30 : f32 to vector<32x128xf32>
    %84 = arith.cmpf oge, %82, %83 : vector<32x128xf32>
    %cst_31 = arith.constant 0.00999999977 : f32
    %85 = vector.broadcast %cst_31 : f32 to vector<32x128xf32>
    %86 = arith.mulf %85, %82 : vector<32x128xf32>
    %87 = arith.select %84, %82, %86 : vector<32x128xi1>, vector<32x128xf32>
    %88 = vector.shape_cast %87 : vector<32x128xf32> to vector<2x16x128xf32>
    %c0_32 = arith.constant 0 : index
    %c0_33 = arith.constant 0 : index
    %c0_34 = arith.constant 0 : index
    %89 = vector.load %arg6[%c0_32, %c0_33, %c0_34] : memref<2x16x128xf32, #tpu.memory_space<vmem>>, vector<2x16x128xf32>
    tpu.vector_store %arg6[%c0_32, %c0_33, %c0_34], %88 {strides = array<i32>} : memref<2x16x128xf32, #tpu.memory_space<vmem>>, vector<2x16x128xf32>,
    return
  }
  func.func @transform_0(%arg0: i32) -> (i32, i32, i32) {
    %c0_i32 = arith.constant 0 : i32
    %c0_i32_0 = arith.constant 0 : i32
    %c0_i32_1 = arith.constant 0 : i32
    return %arg0, %c0_i32, %c0_i32_0 : i32, i32, i32
  }
  func.func @transform_1(%arg0: i32) -> (i32, i32) {
    %c0_i32 = arith.constant 0 : i32
    %c0_i32_0 = arith.constant 0 : i32
    %c0_i32_1 = arith.constant 0 : i32
    return %c0_i32, %c0_i32_0 : i32, i32
  }
  func.func @transform_2(%arg0: i32) -> (i32, i32) {
    %c0_i32 = arith.constant 0 : i32
    %c0_i32_0 = arith.constant 0 : i32
    %c0_i32_1 = arith.constant 0 : i32
    return %c0_i32, %c0_i32_0 : i32, i32
  }
  func.func @transform_3(%arg0: i32) -> (i32, i32) {
    %c0_i32 = arith.constant 0 : i32
    %c0_i32_0 = arith.constant 0 : i32
    %c0_i32_1 = arith.constant 0 : i32
    return %c0_i32, %c0_i32_0 : i32, i32
  }
  func.func @transform_4(%arg0: i32) -> (i32, i32) {
    %c0_i32 = arith.constant 0 : i32
    %c0_i32_0 = arith.constant 0 : i32
    %c0_i32_1 = arith.constant 0 : i32
    return %c0_i32, %c0_i32_0 : i32, i32
  }
  func.func @transform_5(%arg0: i32) -> (i32, i32, i32) {
    %c0_i32 = arith.constant 0 : i32
    %c0_i32_0 = arith.constant 0 : i32
    %c0_i32_1 = arith.constant 0 : i32
    return %arg0, %c0_i32, %c0_i32_0 : i32, i32, i32
  }
}

</mosaic_0001>

<bundles_post_ra>
// kernel: tpu_custom_call.1
= control target key start
LH: loop header
LB: loop body
LE: loop exit
PB: predicated region body
PF: predicated region fallthrough
CT: control target
= control target key end

     0   :  { %10 = vsyncpa [#allocation3], 0  ;;  %s1414_s0 = inlined_call_operand.hbm [shape: f32[2,16,128], index: 0, kind: input, shape index: {}]   ;;  %s1415_s1 = inlined_call_operand.hbm [shape: bf16[384,128], index: 1, kind: input, shape index: {}]   ;;  %s1416_s2 = inlined_call_operand.vmem [shape: f32[1,128], index: 2, kind: input, shape index: {}]   ;;  %s1417_s3 = inlined_call_operand.hbm [shape: bf16[384,128], index: 3, kind: input, shape index: {}]   ;;  %s1418_s4 = inlined_call_operand.vmem [shape: f32[1,128], index: 4, kind: input, shape index: {}]   ;;  %s1419_s5 = inlined_call_operand.hbm [shape: f32[2,16,128], index: 5, kind: output, shape index: {}]  }
   0x1   :  { %11 = vsyncpa [#allocation6], 0 }
   0x2   :  { %12 = vsyncpa [#allocation4], 0  ;;  %s1191_s18 = smov [#allocation5]   ;;  %s1097_s22 = scalar_lea.hbm %s1415_s1, 3072 }
   0x3   :  { %s30_s19 = sshll.u32 %s1191_s18, 4  ;;  %p1098_p0 = scmp.ne.s32.totalorder %s1415_s1, %s1097_s22  ;;  %s31_s19 = int_to_ptr.vmem [resolvable:$true] %s30_s19 }
   0x4   :  { %p1101_p1 = scmp.lt.u32.totalorder %s1097_s22, %s1415_s1 }
   0x6   :  { %p1103_p2 = pnand %p1101_p1, %p1098_p0 }
   0x8   :  { %1106 = shalt.err (!%p1103_p2)
}
   0x9   :  { %s1107_s27 = scalar_lea.vmem %s31_s19, 3072  ;;  %p1112_p4 = scmp.lt.s32.totalorder %s31_s19, %s31_s19 }
   0xa   :  { %p1108_p3 = scmp.ne.s32.totalorder %s31_s19, %s1107_s27  ;;  %p1113_p5 = scmp.lt.s32.totalorder %s1107_s27, %s1107_s27 }
   0xc   :  { %p1114_p6 = por %p1113_p5, %p1112_p4 }
   0xe   :  { %p1115_p7 = pnand %p1114_p6, %p1108_p3 }
  0x10   :  { %1118 = shalt.err (!%p1115_p7)
}
  0x11   :  { %s1192_s28 = smov 64   ;;  %s1193_s29 = smov 4  }
  0x12   :  { %36 = dma.hbm_to_vmem [thread:$0]  %s1415_s1, 3072, %s31_s19, [#allocation6], %s1192_s28, %s1192_s28, %s1193_s29  }
  0x13   :  { %s1194_s7 = smov [#allocation2]   ;;  %s1119_s11 = scalar_lea.hbm %s1414_s0, 512 }
  0x14   :  { %s18_s8 = sshll.u32 %s1194_s7, 4  ;;  %p1120_p8 = scmp.ne.s32.totalorder %s1414_s0, %s1119_s11  ;;  %s19_s8 = int_to_ptr.vmem [resolvable:$true] %s18_s8 }
  0x15   :  { %p1123_p9 = scmp.lt.u32.totalorder %s1119_s11, %s1414_s0 }
  0x17   :  { %p1125_p10 = pnand %p1123_p9, %p1120_p8 }
  0x19   :  { %1128 = shalt.err (!%p1125_p10)
}
  0x1a   :  { %s1129_s16 = scalar_lea.vmem %s19_s8, 512  ;;  %p1134_p12 = scmp.lt.s32.totalorder %s19_s8, %s19_s8 }
  0x1b   :  { %p1130_p11 = scmp.ne.s32.totalorder %s19_s8, %s1129_s16  ;;  %p1135_p13 = scmp.lt.s32.totalorder %s1129_s16, %s1129_s16 }
  0x1d   :  { %p1136_p0 = por %p1135_p13, %p1134_p12 }
  0x1f   :  { %p1137_p1 = pnand %p1136_p0, %p1130_p11 }
  0x21   :  { %1140 = shalt.err (!%p1137_p1)
}
  0x22   :  { %s1195_s1 = smov 128   ;;  %s1196_s17 = smov 8  }
  0x23   :  { %24 = dma.hbm_to_vmem [thread:$0]  %s1414_s0, 512, %s19_s8, [#allocation3], %s1195_s1, %s1195_s1, %s1196_s17  }
  0x24   :  { %s1197_s20 = smov [#allocation7]   ;;  %s1141_s24 = scalar_lea.hbm %s1417_s3, 3072 }
  0x25   :  { %s44_s21 = sshll.u32 %s1197_s20, 4  ;;  %p1142_p2 = scmp.ne.s32.totalorder %s1417_s3, %s1141_s24  ;;  %s45_s21 = int_to_ptr.vmem [resolvable:$true] %s44_s21 }
  0x26   :  { %p1145_p3 = scmp.lt.u32.totalorder %s1141_s24, %s1417_s3 }
  0x28   :  { %p1147_p4 = pnand %p1145_p3, %p1142_p2 }
  0x2a   :  { %1150 = shalt.err (!%p1147_p4)
}
  0x2b   :  { %s1151_s6 = scalar_lea.vmem %s45_s21, 3072  ;;  %p1156_p6 = scmp.lt.s32.totalorder %s45_s21, %s45_s21 }
  0x2c   :  { %p1152_p5 = scmp.ne.s32.totalorder %s45_s21, %s1151_s6  ;;  %p1157_p7 = scmp.lt.s32.totalorder %s1151_s6, %s1151_s6 }
  0x2e   :  { %p1158_p8 = por %p1157_p7, %p1156_p6 }
  0x30   :  { %p1159_p9 = pnand %p1158_p8, %p1152_p5 }
  0x32   :  { %1162 = shalt.err (!%p1159_p9)
}
  0x33   :  { %50 = dma.hbm_to_vmem [thread:$0]  %s1417_s3, 3072, %s45_s21, [#allocation6], %s1192_s28, %s1192_s28, %s1193_s29  }
  0x34   :  { %1185 = dma.done.wait [#allocation3], 512  }
  0x35   :  { %1186 = vsyncadd [#allocation3], 4294966784 }
  0x36   :  { %1187 = dma.done.wait [#allocation6], 6144  }
  0x37   :  { %1188 = vsyncadd [#allocation6], 4294961152  ;;  %v1049_v0 = vld [vmem:[#allocation5 + $0x40] sm:$0xff]   ;;  %v1051_v2 = vld [vmem:[#allocation5 + $0x48] sm:$0xff]   ;;  %v67_v7 = vlaneseq  ;;  %vm1198_vm5 = vmmov 1  }
  0x38   :  { %v1050_v1 = vld [vmem:[#allocation5] sm:$0xff]   ;;  %924 = vmatprep.subr.bf16.mxu0 %v1049_v0  ;;  %v1053_v4 = vld [vmem:[#allocation5 + $0x8] sm:$0xff]   ;;  %v1054_v5 = vld [vmem:[#allocation5 + $0x50] sm:$0xff]  }
  0x39   :  { %925 = vmatpush3.bf16.msra.mxu0 %v1050_v1  ;;  %v1052_v3 = vld [vmem:[#allocation5 + $0x80] sm:$0xff]   ;;  %v1055_v6 = vld [vmem:[#allocation5 + $0x88] sm:$0xff]   ;;  %v1056_v8 = vld [vmem:[#allocation5 + $0x10] sm:$0xff]   ;;  %v1275_v12 = vshrl.u32 %v67_v7, 7 }
  0x3a   :  { %926 = vmatprep.subr.bf16.mxu0 %v1051_v2  ;;  %1000 = vmatprep.subr.bf16.mxu1 %v1052_v3  ;;  %v1057_v9 = vld [vmem:[#allocation5 + $0x58] sm:$0xff]   ;;  %v1058_v10 = vld [vmem:[#allocation5 + $0x90] sm:$0xff]   ;;  %v1060_v13 = vld [vmem:[#allocation5 + $0x60] sm:$0xff]  }
  0x3b   :  { %1001 = vmatpush3.bf16.msra.mxu1 %v1052_v3  ;;  %v1059_v11 = vld [vmem:[#allocation5 + $0x18] sm:$0xff]   ;;  %v1062_v15 = vld [vmem:[#allocation5 + $0x20] sm:$0xff]   ;;  %v69_v16 = vadd.s32 8, %v1275_v12  ;;  %v71_v18 = vadd.s32 24, %v1275_v12  ;;  %v1063_v19 = vld [vmem:[#allocation5 + $0x68] sm:$0xff]   ;;  %v76_v20 = vand.u32 15, %v1275_v12 }
  0x3c   :  { %1002 = vmatprep.subr.bf16.mxu1 %v1055_v6  ;;  %v1061_v14 = vld [vmem:[#allocation5 + $0x98] sm:$0xff]   ;;  %v1064_v17 = vld [vmem:[#allocation5 + $0xa0] sm:$0xff]   ;;  %v70_v21 = vadd.s32 16, %v1275_v12  ;;  %v1065_v22 = vld [vmem:[#allocation5 + $0x28] sm:$0xff]   ;;  %vm132_vm0 = vcmp.lt.s32.totalorder %v1275_v12, 1  ;;  %vm153_vm1 = vcmp.lt.s32.totalorder %v1275_v12, 7 }
  0x3d   :  { %927 = vmatpush3.bf16.msra.mxu0 %v1053_v4  ;;  %v83_v23 = vand.u32 15, %v69_v16  ;;  %v1067_v24 = vld [vmem:[#allocation5 + $0xa8] sm:$0xff]   ;;  %v97_v25 = vand.u32 15, %v71_v18  ;;  %v1066_v26 = vld [vmem:[#allocation5 + $0x70] sm:$0xff]   ;;  %vm1283_vm2 = vcmp.ne.s32.totalorder %v76_v20, 0  ;;  %v1287_v30 = vld [vmem:[#allocation2] sm:$0xff] }
  0x3e   :  { %928 = vmatprep.subr.bf16.mxu0 %v1054_v5  ;;  %v1068_v27 = vld [vmem:[#allocation5 + $0x30] sm:$0xff]   ;;  %v1289_v31 = vld [vmem:[#allocation2 + $0x8] sm:$0xff]  ;;  %v1291_v32 = vld [vmem:[#allocation2 + $0x18] sm:$0xff]  ;;  %v90_v35 = vand.u32 15, %v70_v21  ;;  %v128_v37 = vrot.slane %v1287_v30, 7  ;;  %v149_v43 = vrot.slane %v1287_v30, 1 }
  0x3f   :  { %1003 = vmatpush3.bf16.msra.mxu1 %v1055_v6  ;;  %v1070_v28 = vld [vmem:[#allocation5 + $0xb0] sm:$0xff]   ;;  %vm1293_vm3 = vcmp.ne.s32.totalorder %v83_v23, 15  ;;  %vm1297_vm4 = vcmp.ne.s32.totalorder %v97_v25, 15  ;;  %v1069_v36 = vld [vmem:[#allocation5 + $0x78] sm:$0xff]   ;;  %v129_v38 = vrot.slane %v1289_v31, 7  ;;  %v172_v39 = vpack.c.bf16 %v1289_v31, %v1287_v30  ;;  %vm1313_vm6 = vmpackc.low %vm1198_vm5, %vm1283_vm2 }
  0x40   :  { %1004 = vmatprep.subr.bf16.mxu1 %v1058_v10  ;;  %v131_v40 = vrot.slane %v1291_v32, 7  ;;  %v1071_v41 = vld [vmem:[#allocation5 + $0x38] sm:$0xff]   ;;  %v1306_v42 = vld [vmem:[#allocation2 + $0x10] sm:$0xff]  ;;  %v150_v44 = vrot.slane %v1289_v31, 1  ;;  %v152_v47 = vrot.slane %v1291_v32, 1  ;;  %vm1328_vm7 = vmpackc.low %vm1293_vm3, %vm1198_vm5  ;;  %vm122_vm8 = vcmp.ne.s32.totalorder %v90_v35, 0 }
  0x41   :  { %929 = vmatpush3.bf16.msra.mxu0 %v1056_v8  ;;  %407 = vmatprep.mubr.bf16.mxu0 %v172_v39  ;;  %v151_v46 = vrot.slane %v1306_v42, 1  ;;  %v135_v48 = vsel %vm132_vm0, %v128_v37, %v129_v38  ;;  %v1072_v50 = vld [vmem:[#allocation5 + $0xb8] sm:$0xff]   ;;  %v1073_v54 = vld [vmem:[#allocation7 + $0x40] sm:$0xff]   ;;  %vm1337_vm9 = vmpackc.low %vm1297_vm4, %vm1198_vm5  ;;  %v173_v61 = vpack.c.bf16 %v1291_v32, %v1306_v42  ;;  %v130_v62 = vrot.slane %v1306_v42, 7 }
  0x42   :  { %930 = vmatprep.subr.bf16.mxu0 %v1057_v9  ;;  %v136_v49 = vsel %vm132_vm0, %v131_v40, %v128_v37  ;;  %v156_v51 = vsel %vm153_vm1, %v149_v43, %v150_v44  ;;  %v157_v59 = vsel %vm153_vm1, %v152_v47, %v149_v43  ;;  %v1074_v60 = vld [vmem:[#allocation7 + $0x80] sm:$0xff]   ;;  %vm1349_vm10 = vmpackc.low %vm1198_vm5, %vm122_vm8  ;;  %v1076_v1 = vld [vmem:[#allocation7 + $0x48] sm:$0xff]  }
  0x43   :  { %1005 = vmatpush3.bf16.msra.mxu1 %v1058_v10  ;;  %v155_v53 = vsel %vm153_vm1, %v150_v44, %v151_v46  ;;  %v876_v57 = vpack.c.bf16 %v135_v48, %v136_v49  ;;  %v154_v58 = vsel %vm153_vm1, %v151_v46, %v152_v47  ;;  %v1075_v0 = vld [vmem:[#allocation7] sm:$0xff]   ;;  %v1077_v3 = vld [vmem:[#allocation7 + $0x88] sm:$0xff]   ;;  %v133_v5 = vsel %vm132_vm0, %v130_v62, %v131_v40  ;;  %v1079_v8 = vld [vmem:[#allocation7 + $0x50] sm:$0xff]  }
  0x44   :  { %1006 = vmatprep.subr.bf16.mxu1 %v1061_v14  ;;  %v882_v55 = vpack.c.bf16 %v155_v53, %v156_v51  ;;  %v885_v2 = vpack.c.bf16 %v157_v59, %v154_v58  ;;  %v1078_v4 = vld [vmem:[#allocation7 + $0x8] sm:$0xff]   ;;  %v134_v6 = vsel %vm132_vm0, %v129_v38, %v130_v62  ;;  %v1080_v9 = vld [vmem:[#allocation7 + $0x90] sm:$0xff]   ;;  %v1086_v16 = vld [vmem:[#allocation7 + $0xa0] sm:$0xff]  }
  0x45   :  { %931 = vmatpush3.bf16.msra.mxu0 %v1059_v11  ;;  %v879_v7 = vpack.c.bf16 %v133_v5, %v134_v6  ;;  %v1081_v10 = vld [vmem:[#allocation7 + $0x10] sm:$0xff]   ;;  %v1082_v11 = vld [vmem:[#allocation7 + $0x58] sm:$0xff]   ;;  %v1088_v18 = vld [vmem:[#allocation7 + $0x68] sm:$0xff]  }
  0x46   :  { %932 = vmatprep.subr.bf16.mxu0 %v1060_v13  ;;  %1016 = vmatprep.mubr.msk.bf16.mxu1 %vm1328_vm7, %v882_v55  ;;  %v1083_v13 = vld [vmem:[#allocation7 + $0x98] sm:$0xff]   ;;  %v1090_v20 = vld [vmem:[#allocation7 + $0x28] sm:$0xff]   ;;  %v1091_v21 = vld [vmem:[#allocation7 + $0x70] sm:$0xff]  }
  0x47   :  { %1007 = vmatpush3.bf16.msra.mxu1 %v1061_v14  ;;  %v1084_v14 = vld [vmem:[#allocation7 + $0x18] sm:$0xff]   ;;  %v1093_v23 = vld [vmem:[#allocation7 + $0x30] sm:$0xff]   ;;  %v850_v29 = vld [vmem:[%s1416_s2] ss:$0 sm:$0xff] }
  0x48   :  { %1008 = vmatprep.subr.bf16.mxu1 %v1064_v17  ;;  %v1095_v25 = vld [vmem:[#allocation7 + $0xb8] sm:$0xff]   ;;  %v887_v52 = vld [vmem:[%s1418_s4] ss:$0 sm:$0xff]  ;;  %s1199_s4 = smov [#allocation8]  }
  0x49   :  { %933 = vmatpush3.bf16.msra.mxu0 %v1062_v15  ;;  %v1085_v15 = vld [vmem:[#allocation7 + $0x60] sm:$0xff]   ;;  %s837_s8 = sshll.u32 %s1199_s4, 4  ;;  %s838_s8 = int_to_ptr.vmem [resolvable:$true] %s837_s8 }
  0x4a   :  { %934 = vmatprep.subr.bf16.mxu0 %v1063_v19  ;;  %v1089_v19 = vld [vmem:[#allocation7 + $0xa8] sm:$0xff]   ;;  %s1163_s9 = scalar_lea.vmem %s838_s8, 512  ;;  %p1168_p11 = scmp.lt.s32.totalorder %s838_s8, %s838_s8 }
  0x4b   :  { %1009 = vmatpush3.bf16.msra.mxu1 %v1064_v17  ;;  %v1087_v17 = vld [vmem:[#allocation7 + $0x20] sm:$0xff]   ;;  %p1164_p10 = scmp.ne.s32.totalorder %s838_s8, %s1163_s9  ;;  %p1169_p12 = scmp.lt.s32.totalorder %s1163_s9, %s1163_s9 }
  0x4c   :  { %1010 = vmatprep.subr.bf16.mxu1 %v1067_v24 }
  0x4d   :  { %935 = vmatpush3.bf16.msra.mxu0 %v1065_v22  ;;  %v1092_v22 = vld [vmem:[#allocation7 + $0xb0] sm:$0xff]   ;;  %p1170_p13 = por %p1169_p12, %p1168_p11 }
  0x4e   :  { %936 = vmatprep.subr.bf16.mxu0 %v1066_v26  ;;  %v1096_v26 = vld [vmem:[#allocation7 + $0x38] sm:$0xff]  }
  0x4f   :  { %1011 = vmatpush3.bf16.msra.mxu1 %v1067_v24  ;;  %v1094_v24 = vld [vmem:[#allocation7 + $0x78] sm:$0xff]   ;;  %p1171_p0 = pnand %p1170_p13, %p1164_p10 }
  0x50   :  { %1012 = vmatprep.subr.bf16.mxu1 %v1070_v28 }
  0x51   :  { %937 = vmatpush3.bf16.msra.mxu0 %v1068_v27 }
  0x52   :  { %938 = vmatprep.subr.bf16.mxu0 %v1069_v36 }
  0x53   :  { %1013 = vmatpush3.bf16.msra.mxu1 %v1070_v28 }
  0x54   :  { %1014 = vmatprep.subr.bf16.mxu1 %v1072_v50 }
  0x55   :  { %939 = vmatpush3.bf16.msra.mxu0 %v1071_v41 }
  0x56   :  { %962 = vmatprep.subr.bf16.mxu0 %v1073_v54 }
  0x57   :  { %1015 = vmatpush3.bf16.msra.mxu1 %v1072_v50 }
  0x58   :  { %877 = vmatmul.mubr.msk.bf16.vlgmr.msra.gmra.mrb[0].mxu0 %vm1313_vm6, %v876_v57  ;;  %1020 = vmatprep.subr.bf16.mxu1 %v1074_v60 }
  0x59   :  { %415 = vmatprep.mubr.bf16.mxu0 %v173_v61  ;;  %963 = vmatpush3.bf16.msra.mxu0 %v1075_v0 }
  0x5a   :  { %1017 = vmatmul.mubr.msk.bf16.vlgmr.msra.gmra.mrb[0].mxu1 %vm1337_vm9, %v885_v2  ;;  %964 = vmatprep.subr.bf16.mxu0 %v1076_v1 }
  0x5b   :  { %1021 = vmatpush3.bf16.msra.mxu1 %v1074_v60 }
  0x5c   :  { %1022 = vmatprep.subr.bf16.mxu1 %v1077_v3 }
  0x5d   :  { %965 = vmatpush3.bf16.msra.mxu0 %v1078_v4 }
  0x5e   :  { %966 = vmatprep.subr.bf16.mxu0 %v1079_v8 }
  0x5f   :  { %1023 = vmatpush3.bf16.msra.mxu1 %v1077_v3 }
  0x60   :  { %880 = vmatmul.mubr.msk.bf16.gmra.mrb[4].mxu0 %vm1349_vm10, %v879_v7  ;;  %1024 = vmatprep.subr.bf16.mxu1 %v1080_v9 }
  0x61   :  { %967 = vmatpush3.bf16.msra.mxu0 %v1081_v10 }
  0x62   :  { %968 = vmatprep.subr.bf16.mxu0 %v1082_v11 }
  0x63   :  { %1025 = vmatpush3.bf16.msra.mxu1 %v1080_v9 }
  0x64   :  { %1026 = vmatprep.subr.bf16.mxu1 %v1083_v13 }
  0x65   :  { %969 = vmatpush3.bf16.msra.mxu0 %v1084_v14 }
  0x66   :  { %970 = vmatprep.subr.bf16.mxu0 %v1085_v15 }
  0x67   :  { %1027 = vmatpush3.bf16.msra.mxu1 %v1083_v13 }
  0x68   :  { %1028 = vmatprep.subr.bf16.mxu1 %v1086_v16 }
  0x69   :  { %971 = vmatpush3.bf16.msra.mxu0 %v1087_v17 }
  0x6a   :  { %972 = vmatprep.subr.bf16.mxu0 %v1088_v18 }
  0x6b   :  { %1029 = vmatpush3.bf16.msra.mxu1 %v1086_v16 }
  0x6c   :  { %1030 = vmatprep.subr.bf16.mxu1 %v1089_v19 }
  0x6d   :  { %973 = vmatpush3.bf16.msra.mxu0 %v1090_v20 }
  0x6e   :  { %974 = vmatprep.subr.bf16.mxu0 %v1091_v21 }
  0x6f   :  { %1031 = vmatpush3.bf16.msra.mxu1 %v1089_v19 }
  0x70   :  { %1032 = vmatprep.subr.bf16.mxu1 %v1092_v22 }
  0x71   :  { %975 = vmatpush3.bf16.msra.mxu0 %v1093_v23 }
  0x72   :  { %976 = vmatprep.subr.bf16.mxu0 %v1094_v24 }
  0x73   :  { %1033 = vmatpush3.bf16.msra.mxu1 %v1092_v22 }
  0x74   :  { %1034 = vmatprep.subr.bf16.mxu1 %v1095_v25 }
  0x75   :  { %977 = vmatpush3.bf16.msra.mxu0 %v1096_v26 }
  0x77   :  { %1035 = vmatpush3.bf16.msra.mxu1 %v1095_v25 }
 0x12b   :  { %v940_v27 = vpop.f32.mrb[0].mxu0 }
 0x12c   :  { %v941_v28 = vpop.f32.mrb[1].mxu0 }
 0x12d   :  { %v942_v33 = vadd.f32 %v941_v28, %v940_v27  ;;  %v943_v34 = vpop.f32.mrb[2].mxu0  ;;  %v1018_v36 = vpop.f32.mrb[0].mxu1 }
 0x12e   :  { %v944_v35 = vpop.f32.mrb[3].mxu0  ;;  %v458_v39 = vpop.f32.mrb[1].mxu1 }
 0x12f   :  { %v945_v37 = vadd.f32 %v944_v35, %v943_v34  ;;  %v410_v38 = vadd.f32 %v942_v33, %v850_v29  ;;  %v1019_v40 = vpop.f32.mrb[2].mxu1 }
 0x130   :  { %v461_v44 = vpop.f32.mrb[3].mxu1 }
 0x131   :  { %v459_v41 = vadd.f32 %v458_v39, %v410_v38  ;;  %v413_v43 = vadd.f32 %v945_v37, %v850_v29 }
 0x133   :  { %vm473_vm11 = vcmp.ge.f32.partialorder %v459_v41, 0.0  ;;  %v477_v46 = vmul.f32 0.01, %v459_v41  ;;  %v462_v47 = vadd.f32 %v461_v44, %v413_v43  ;;  %v946_v48 = vpop.f32.mrb[4].mxu0 }
 0x134   :  { %v947_v49 = vpop.f32.mrb[5].mxu0 }
 0x135   :  { %v481_v50 = vsel %vm473_vm11, %v459_v41, %v477_v46  ;;  %vm474_vm12 = vcmp.ge.f32.partialorder %v462_v47, 0.0  ;;  %v478_v51 = vmul.f32 0.01, %v462_v47  ;;  %v948_v53 = vadd.f32 %v947_v49, %v946_v48  ;;  %v949_v54 = vpop.f32.mrb[6].mxu0 }
 0x136   :  { %v950_v55 = vpop.f32.mrb[7].mxu0  ;;  %v485_v57 = vrot.slane %v481_v50, 7  ;;  %v497_v61 = vrot.slane %v481_v50, 1 }
 0x137   :  { %v482_v58 = vsel %vm474_vm12, %v462_v47, %v478_v51  ;;  %v418_v59 = vadd.f32 %v948_v53, %v850_v29  ;;  %v951_v60 = vadd.f32 %v950_v55, %v949_v54 }
 0x138   :  { %v486_v62 = vrot.slane %v482_v58, 7  ;;  %v498_v0 = vrot.slane %v482_v58, 1  ;;  %v511_v1 = vpack.c.bf16 %v482_v58, %v481_v50 }
 0x139   :  { %v467_v2 = vadd.f32 %v1018_v36, %v418_v59  ;;  %v421_v3 = vadd.f32 %v951_v60, %v850_v29 }
 0x13a   :  { %v491_v4 = vsel %vm132_vm0, %v485_v57, %v486_v62  ;;  %746 = vmatprep.mubr.bf16.mxu0 %v511_v1  ;;  %v503_v5 = vsel %vm153_vm1, %v497_v61, %v498_v0 }
 0x13b   :  { %vm475_vm13 = vcmp.ge.f32.partialorder %v467_v2, 0.0  ;;  %v479_v6 = vmul.f32 0.01, %v467_v2  ;;  %v470_v7 = vadd.f32 %v1019_v40, %v421_v3 }
 0x13d   :  { %v483_v8 = vsel %vm475_vm13, %v467_v2, %v479_v6  ;;  %vm476_vm14 = vcmp.ge.f32.partialorder %v470_v7, 0.0  ;;  %v480_v9 = vmul.f32 0.01, %v470_v7 }
 0x13e   :  { %v487_v10 = vrot.slane %v483_v8, 7  ;;  %v499_v11 = vrot.slane %v483_v8, 1 }
 0x13f   :  { %v484_v13 = vsel %vm476_vm14, %v470_v7, %v480_v9 }
 0x140   :  { %v488_v14 = vrot.slane %v484_v13, 7  ;;  %v500_v15 = vrot.slane %v484_v13, 1  ;;  %v502_v16 = vsel %vm153_vm1, %v498_v0, %v499_v11  ;;  %v512_v17 = vpack.c.bf16 %v484_v13, %v483_v8 }
 0x141   :  { %v919_v18 = vpack.c.bf16 %v502_v16, %v503_v5  ;;  %v490_v19 = vsel %vm132_vm0, %v486_v62, %v487_v10 }
 0x142   :  { %v492_v20 = vsel %vm132_vm0, %v488_v14, %v485_v57  ;;  %v501_v21 = vsel %vm153_vm1, %v499_v11, %v500_v15  ;;  %v504_v22 = vsel %vm153_vm1, %v500_v15, %v497_v61  ;;  %v489_v23 = vsel %vm132_vm0, %v487_v10, %v488_v14 }
 0x143   :  { %v913_v24 = vpack.c.bf16 %v491_v4, %v492_v20  ;;  %1036 = vmatprep.mubr.msk.bf16.mxu1 %vm1328_vm7, %v919_v18  ;;  %v922_v25 = vpack.c.bf16 %v504_v22, %v501_v21  ;;  %v916_v26 = vpack.c.bf16 %v489_v23, %v490_v19 }
 0x145   :  { %914 = vmatmul.mubr.msk.bf16.vlgmr.msra.gmra.mrb[8].mxu0 %vm1313_vm6, %v913_v24  ;;  %1037 = vmatmul.mubr.msk.bf16.vlgmr.msra.gmra.mrb[4].mxu1 %vm1337_vm9, %v922_v25 }
 0x146   :  { %754 = vmatprep.mubr.bf16.mxu0 %v512_v17 }
 0x14d   :  { %917 = vmatmul.mubr.msk.bf16.gmra.mrb[12].mxu0 %vm1349_vm10, %v916_v26 }
 0x218   :  { %v978_v27 = vpop.f32.mrb[8].mxu0  ;;  %v1038_v28 = vpop.f32.mrb[4].mxu1 }
 0x219   :  { %v979_v12 = vpop.f32.mrb[9].mxu0  ;;  %v797_v29 = vpop.f32.mrb[5].mxu1 }
 0x21a   :  { %v980_v33 = vadd.f32 %v979_v12, %v978_v27  ;;  %v981_v34 = vpop.f32.mrb[10].mxu0  ;;  %v1039_v35 = vpop.f32.mrb[6].mxu1 }
 0x21b   :  { %v982_v45 = vpop.f32.mrb[11].mxu0  ;;  %v800_v36 = vpop.f32.mrb[7].mxu1 }
 0x21c   :  { %v749_v37 = vadd.f32 %v980_v33, %v887_v52  ;;  %v983_v56 = vadd.f32 %v982_v45, %v981_v34 }
 0x21e   :  { %v798_v38 = vadd.f32 %v797_v29, %v749_v37  ;;  %v752_v39 = vadd.f32 %v983_v56, %v887_v52 }
 0x220   :  { %v812_v63 = vadd.f32 %v798_v38, %v1287_v30  ;;  %v801_v40 = vadd.f32 %v800_v36, %v752_v39  ;;  %v984_v41 = vpop.f32.mrb[12].mxu0 }
 0x221   :  { %v985_v43 = vpop.f32.mrb[13].mxu0 }
 0x222   :  { %vm816_vm15 = vcmp.ge.f32.partialorder %v812_v63, 0.0  ;;  %v820_v44 = vmul.f32 0.01, %v812_v63  ;;  %v813_v46 = vadd.f32 %v801_v40, %v1289_v31  ;;  %v986_v47 = vadd.f32 %v985_v43, %v984_v41  ;;  %v987_v48 = vpop.f32.mrb[14].mxu0 }
 0x223   :  { %v988_v49 = vpop.f32.mrb[15].mxu0 }
 0x224   :  { %v824_v50 = vsel %vm816_vm15, %v812_v63, %v820_v44  ;;  %vm817_vm0 = vcmp.ge.f32.partialorder %v813_v46, 0.0  ;;  %v821_v51 = vmul.f32 0.01, %v813_v46  ;;  %v757_v53 = vadd.f32 %v986_v47, %v887_v52 }
 0x225   :  { %828 = vst [vmem:[#allocation8] sm:$0xff] %v824_v50  ;;  %v989_v54 = vadd.f32 %v988_v49, %v987_v48 }
 0x226   :  { %v825_v55 = vsel %vm817_vm0, %v813_v46, %v821_v51  ;;  %v806_v57 = vadd.f32 %v1038_v28, %v757_v53 }
 0x227   :  { %829 = vst [vmem:[#allocation8 + $0x8] sm:$0xff] %v825_v55  ;;  %v760_v30 = vadd.f32 %v989_v54, %v887_v52 }
 0x228   :  { %v814_v58 = vadd.f32 %v806_v57, %v1306_v42 }
 0x229   :  { %v809_v59 = vadd.f32 %v1039_v35, %v760_v30 }
 0x22a   :  { %vm818_vm1 = vcmp.ge.f32.partialorder %v814_v58, 0.0  ;;  %v822_v60 = vmul.f32 0.01, %v814_v58 }
 0x22b   :  { %v815_v31 = vadd.f32 %v809_v59, %v1291_v32 }
 0x22c   :  { %v826_v61 = vsel %vm818_vm1, %v814_v58, %v822_v60 }
 0x22d   :  { %vm819_vm2 = vcmp.ge.f32.partialorder %v815_v31, 0.0  ;;  %v823_v62 = vmul.f32 0.01, %v815_v31  ;;  %830 = vst [vmem:[#allocation8 + $0x10] sm:$0xff] %v826_v61 }
 0x22f   :  { %v827_v0 = vsel %vm819_vm2, %v815_v31, %v823_v62 }
 0x230   :  { %831 = vst [vmem:[#allocation8 + $0x18] sm:$0xff] %v827_v0 }
 0x231   :  { %1174 = shalt.err (!%p1171_p0)
}
 0x232   :  { %s1175_s12 = scalar_lea.hbm %s1419_s5, 512 }
 0x233   :  { %p1176_p1 = scmp.ne.s32.totalorder %s1419_s5, %s1175_s12  ;;  %p1179_p2 = scmp.lt.u32.totalorder %s1175_s12, %s1419_s5 }
 0x235   :  { %p1181_p3 = pnand %p1179_p2, %p1176_p1 }
 0x237   :  { %1184 = shalt.err (!%p1181_p3)
}
 0x238   :  { %843 = dma.vmem_to_hbm [thread:$0]  %s838_s8, 512, %s1419_s5, [#allocation4], %s1195_s1, %s1195_s1, %s1196_s17  }
 0x239   :  { %1189 = dma.done.wait [#allocation4], 512  }
 0x23a   :  { %1190 = vsyncadd [#allocation4], 4294966784 }
 0x23b   :  { %847 = vsyncpa [#allocation3], 1 }
 0x23c   :  { %848 = vsyncpa [#allocation6], 1 }
 0x23d   :  { %849 = vsyncpa [#allocation4], 1 }

</bundles_post_ra>
